<compile_context>
chip_gen: v5e
topology: v5e:2x2
jax: 0.10.0
libtpu: 0.0.40
codegen_flags: <defaults>
</compile_context>

<pallas_src>
import functools

import jax
import jax.numpy as jnp
from jax.experimental import pallas as pl
from jax.experimental.pallas import tpu as pltpu


def _layernorm(x, gamma, beta, eps):
    mu = jnp.mean(x, axis=-1, keepdims=True)
    var = jnp.mean((x - mu) ** 2, axis=-1, keepdims=True)
    return (x - mu) * jax.lax.rsqrt(var + eps) * gamma + beta


# --------------------------- fused Pallas kernel ----------------------------

def _stack_gated_cnn_kernel(
        x_ref, cgw_ref, w1_ref, w2_ref, vec_ref,     # inputs
        out_ref,                                     # output
        x_sc,                                        # VMEM residual-stream carry
        *, kernel_size, matmul_dtype, eps):
    layer = pl.program_id(1)

    # Load the activation into the VMEM-resident carry at the first layer of
    # each batch tile; it never touches HBM again until the final store.
    @pl.when(layer == 0)
    def _():
        x_sc[...] = x_ref[...].astype(jnp.float32)

    bt, seq, hid = x_sc.shape
    rows = bt * seq
    pad = (kernel_size - 1) // 2

    x3 = x_sc[...]                              # [bt, S, H] fp32 residual stream
    x2 = x3.reshape(rows, hid)
    xm = x3.astype(matmul_dtype)

    # ---- GatedCNN via in-kernel im2col -------------------------------------
    # Zero-pad the sequence axis once (handles the Conv1d boundary), take K
    # static shifted views (batch boundaries are safe: batch is its own axis),
    # concatenate on the lane axis -> one contraction [rows, K*H] @ [K*H, 2H]
    # computing BOTH conv branches (cnn | gate packed along the output axis).
    if pad > 0:
        zpad = jnp.zeros((bt, pad, hid), matmul_dtype)
        xp = jnp.concatenate([zpad, xm, zpad], axis=1)        # [bt, S+2p, H]
    else:
        xp = xm
    cols = [xp[:, kk:kk + seq, :] for kk in range(kernel_size)]
    xcol = jnp.concatenate(cols, axis=-1).reshape(rows, kernel_size * hid)

    ag = jnp.dot(xcol, cgw_ref[0],
                 preferred_element_type=jnp.float32)          # [rows, 2H]
    gated = ag[:, :hid] * jax.nn.sigmoid(ag[:, hid:])         # fp32 VPU/EUP math

    # ---- consolidated per-layer vectors: [8, H] slab ------------------------
    # rows: 0 ff1_b, 1 ff2_b, 2 ln1_g, 3 ln1_b, 4 ln2_g, 5 ln2_b (6,7 unused)
    vec = vec_ref[0]                                          # [8, H] fp32
    b1, b2 = vec[0:1, :], vec[1:2, :]
    ln1_g, ln1_b = vec[2:3, :], vec[3:4, :]
    ln2_g, ln2_b = vec[4:5, :], vec[5:6, :]

    # residual + LayerNorm (bn_after_gcnn)
    y = _layernorm(x2 + gated, ln1_g, ln1_b, eps)

    # ---- position-wise FFN (Linear -> ReLU -> Linear) + residual + LN ------
    h = jnp.dot(y.astype(matmul_dtype), w1_ref[0],
                preferred_element_type=jnp.float32) + b1
    h = jnp.maximum(h, 0.0)
    h = jnp.dot(h.astype(matmul_dtype), w2_ref[0],
                preferred_element_type=jnp.float32) + b2
    y = _layernorm(y + h, ln2_g, ln2_b, eps)

    x_sc[...] = y.reshape(bt, seq, hid)                       # carry to next layer

    @pl.when(layer == pl.num_programs(1) - 1)
    def _():
        out_ref[...] = x_sc[...].astype(out_ref.dtype)


# --------------------------- wrapper / packing -------------------------------

def _pack_params(params, matmul_dtype):
    H = params["hidden_size"]
    K = params["kernel_size"]
    layers = params["layers"]

    def conv_cols(w_oik):              # torch Conv1d [O, I, K] -> im2col [K*I, O]
        return jnp.transpose(w_oik, (2, 1, 0)).reshape(K * H, H)

    cgw = jnp.stack([
        jnp.concatenate([conv_cols(l["cnn_w"]), conv_cols(l["gate_w"])], axis=-1)
        for l in layers]).astype(matmul_dtype)                       # [L, K*H, 2H]
    w1 = jnp.stack([l["ff1_w"].T for l in layers]).astype(matmul_dtype)   # [L, H, H]
    w2 = jnp.stack([l["ff2_w"].T for l in layers]).astype(matmul_dtype)   # [L, H, H]
    zero = jnp.zeros((H,), jnp.float32)
    vec = jnp.stack([jnp.stack([l["ff1_b"], l["ff2_b"],
                                l["ln1_g"], l["ln1_b"],
                                l["ln2_g"], l["ln2_b"], zero, zero])
                     for l in layers]).astype(jnp.float32)           # [L, 8, H]
    return cgw, w1, w2, vec


def _round_up(v, m):
    return -(-v // m) * m


def _pick_batch_tile(B, S, target_rows=512):
    """Largest divisor of B with batch_tile*S <= target_rows (MXU row fill)."""
    best = 1
    for bt in range(1, B + 1):
        if B % bt == 0 and bt * S <= max(target_rows, S):
            best = bt
    return best


def stack_gated_cnn_forward(params, x, *, matmul_dtype=jnp.bfloat16, batch_tile=None):
    B, S, H = x.shape
    L = params["num_layers"]
    K = params["kernel_size"]
    assert K % 2 == 1, "StackGatedCNN needs odd kernel_size (else Conv1d out len != S)"
    assert H == params["hidden_size"] and len(params["layers"]) == L

    if batch_tile is None:
        # NOTE: on v7x keep B // batch_tile >= 2 for production shapes so both
        # TensorCores get batch tiles via the "parallel" axis.
        batch_tile = _pick_batch_tile(B, S)
    assert B % batch_tile == 0
    nb = B // batch_tile

    cgw, w1, w2, vec = _pack_params(params, matmul_dtype)

    kern = functools.partial(_stack_gated_cnn_kernel, kernel_size=K,
                             matmul_dtype=matmul_dtype, eps=1e-5)

    def per_layer(shape):
        return pl.BlockSpec((1,) + shape, lambda b, l: (l, 0, 0))

    grid_spec = pltpu.PrefetchScalarGridSpec(
        num_scalar_prefetch=0,
        grid=(nb, L),                                              # (batch tiles, layers)
        in_specs=[
            pl.BlockSpec((batch_tile, S, H), lambda b, l: (b, 0, 0)),   # x
            per_layer((K * H, 2 * H)),                                  # cnn|gate im2col weights
            per_layer((H, H)),                                          # ff1 weight
            per_layer((H, H)),                                          # ff2 weight
            per_layer((8, H)),                                          # biases + LN params
        ],
        out_specs=pl.BlockSpec((batch_tile, S, H), lambda b, l: (b, 0, 0)),
        scratch_shapes=[pltpu.VMEM((batch_tile, S, H), jnp.float32)],
    )

    # Explicit VMEM budget (padded, double-buffered, generous slop) so the
    # scoped limit neither silently shrinks tiling on v5e (16 MiB default)
    # nor overshoots v7x (64 MiB physical).
    mm = jnp.dtype(matmul_dtype).itemsize
    hp = _round_up(H, 128)
    rows_p = _round_up(batch_tile * S, 8)
    weight_b = (K * hp * 2 * hp + 2 * hp * hp) * mm + 8 * hp * 4
    act_b = rows_p * hp * 4
    need = 2 * weight_b + 4 * act_b + act_b + (2 << 20)
    vmem_limit = int(min(max(2 * need, 8 << 20), 96 << 20))

    return pl.pallas_call(
        kern,
        out_shape=jax.ShapeDtypeStruct((B, S, H), jnp.float32),
        grid_spec=grid_spec,
        compiler_params=pltpu.CompilerParams(
            dimension_semantics=("parallel", "arbitrary"),
            vmem_limit_bytes=vmem_limit),
    )(x, cgw, w1, w2, vec)


# --------------------------- plain-JAX reference ----------------------------

def _conv1d_ref(x_bsh, w_oik, pad):
    xin = jnp.transpose(x_bsh, (0, 2, 1))          # x.transpose(1,2) -> NCW
    y = jax.lax.conv_general_dilated(
        xin, w_oik, window_strides=(1,), padding=[(pad, pad)],
        dimension_numbers=("NCH", "OIH", "NCH"),
        precision=jax.lax.Precision.HIGHEST)
    return jnp.transpose(y, (0, 2, 1))             # back to [B, S, H]


def _ln_ref(x, g, b, eps=1e-5):
    mu = jnp.mean(x, axis=-1, keepdims=True)
    var = jnp.mean((x - mu) ** 2, axis=-1, keepdims=True)
    return (x - mu) * jax.lax.rsqrt(var + eps) * g + b


def stack_gated_cnn_reference(params, x):
    """Direct transcription of PyTorch StackGatedCNN.forward (fp32)."""
    K = params["kernel_size"]
    pad = (K - 1) // 2
    hp = jax.lax.Precision.HIGHEST
    for lyr in params["layers"]:
        a = _conv1d_ref(x, lyr["cnn_w"], pad)
        g = jax.nn.sigmoid(_conv1d_ref(x, lyr["gate_w"], pad))
        x = _ln_ref(a * g + x, lyr["ln1_g"], lyr["ln1_b"])
        l1 = jax.nn.relu(jnp.dot(x, lyr["ff1_w"].T, precision=hp) + lyr["ff1_b"])
        l2 = jnp.dot(l1, lyr["ff2_w"].T, precision=hp) + lyr["ff2_b"]
        x = _ln_ref(x + l2, lyr["ln2_g"], lyr["ln2_b"])
    return x


# --------------------------- params & demo ----------------------------------

def init_params(key, hidden_size=32, kernel_size=3, num_layers=3):
    def nrm(k, shape, scale=0.02):
        return scale * jax.random.normal(k, shape, jnp.float32)

    layers = []
    for lk in jax.random.split(key, num_layers):
        ks = jax.random.split(lk, 10)
        layers.append({
            "cnn_w": nrm(ks[0], (hidden_size, hidden_size, kernel_size)),
            "gate_w": nrm(ks[1], (hidden_size, hidden_size, kernel_size)),
            "ff1_w": nrm(ks[2], (hidden_size, hidden_size)),
            "ff1_b": nrm(ks[3], (hidden_size,)),
            "ff2_w": nrm(ks[4], (hidden_size, hidden_size)),
            "ff2_b": nrm(ks[5], (hidden_size,)),
            "ln1_g": 1.0 + nrm(ks[6], (hidden_size,)),
            "ln1_b": nrm(ks[7], (hidden_size,)),
            "ln2_g": 1.0 + nrm(ks[8], (hidden_size,)),
            "ln2_b": nrm(ks[9], (hidden_size,)),
        })
    return {"hidden_size": hidden_size, "kernel_size": kernel_size,
            "num_layers": num_layers, "layers": layers}


if __name__ == "__main__":
    key = jax.random.PRNGKey(0)
    kp, kx = jax.random.split(key)

    B, S, H, K, L = 2, 8, 32, 3, 3
    params = init_params(kp, hidden_size=H, kernel_size=K, num_layers=L)
    x = jax.random.normal(kx, (B, S, H), jnp.float32)

    # 1) fp32-matmul path, validated against the plain-JAX reference forward.
    out_f32 = jax.block_until_ready(
        stack_gated_cnn_forward(params, x, matmul_dtype=jnp.float32))
    ref = stack_gated_cnn_reference(params, x)
    err = float(jnp.max(jnp.abs(out_f32 - ref)))
    assert out_f32.shape == (B, S, H) and out_f32.dtype == jnp.float32
    assert err < 2e-2, f"max |pallas - ref| = {err}"

    # 2) fast path: bf16 MXU inputs, fp32 accumulation + fp32 LN/sigmoid/relu.
    out = jax.block_until_ready(stack_gated_cnn_forward(params, x))
    assert out.shape == (B, S, H) and out.dtype == jnp.float32
    assert bool(jnp.all(jnp.isfinite(out)))
    print("KERNEL_OK")
</pallas_src>

<mosaic_0001>
module attributes {stable_mosaic.version = 11 : i64} {
  func.func @_stack_gated_cnn_kernel(%arg0: i32, %arg1: i32, %arg2: memref<2x8x32xf32, #tpu.memory_space<vmem>>, %arg3: memref<1x96x64xf32, #tpu.memory_space<vmem>>, %arg4: memref<1x32x32xf32, #tpu.memory_space<vmem>>, %arg5: memref<1x32x32xf32, #tpu.memory_space<vmem>>, %arg6: memref<1x8x32xf32, #tpu.memory_space<vmem>>, %arg7: memref<2x8x32xf32, #tpu.memory_space<vmem>>, %arg8: memref<2x8x32xf32, #tpu.memory_space<vmem>>) attributes {dimension_semantics = [#tpu.dimension_semantics<parallel>, #tpu.dimension_semantics<arbitrary>], iteration_bounds = array<i64: 1, 3>, scalar_prefetch = 0 : i64, scratch_operands = 1 : i64, tpu.core_type = #tpu.core_type<tc>, window_params = [{transform_indices = @transform_0, window_bounds = array<i64: 2, 8, 32>}, {transform_indices = @transform_1, window_bounds = array<i64: 1, 96, 64>}, {transform_indices = @transform_2, window_bounds = array<i64: 1, 32, 32>}, {transform_indices = @transform_3, window_bounds = array<i64: 1, 32, 32>}, {transform_indices = @transform_4, window_bounds = array<i64: 1, 8, 32>}, {transform_indices = @transform_5, window_bounds = array<i64: 2, 8, 32>}]} {
    %c0_i32 = arith.constant 0 : i32
    %0 = arith.cmpi eq, %arg1, %c0_i32 : i32
    %1 = arith.extui %0 : i1 to i32
    %c0_i32_0 = arith.constant 0 : i32
    %2 = arith.cmpi ne, %1, %c0_i32_0 : i32
    scf.if %2 {
      %c0_34 = arith.constant 0 : index
      %c0_35 = arith.constant 0 : index
      %c0_36 = arith.constant 0 : index
      %94 = vector.load %arg2[%c0_34, %c0_35, %c0_36] : memref<2x8x32xf32, #tpu.memory_space<vmem>>, vector<2x8x32xf32>
      %c0_37 = arith.constant 0 : index
      %c0_38 = arith.constant 0 : index
      %c0_39 = arith.constant 0 : index
      %95 = vector.load %arg8[%c0_37, %c0_38, %c0_39] : memref<2x8x32xf32, #tpu.memory_space<vmem>>, vector<2x8x32xf32>
      tpu.vector_store %arg8[%c0_37, %c0_38, %c0_39], %94 {strides = array<i32>} : memref<2x8x32xf32, #tpu.memory_space<vmem>>, vector<2x8x32xf32>,
    } else {
    }
    %c0 = arith.constant 0 : index
    %c0_1 = arith.constant 0 : index
    %c0_2 = arith.constant 0 : index
    %3 = vector.load %arg8[%c0, %c0_1, %c0_2] : memref<2x8x32xf32, #tpu.memory_space<vmem>>, vector<2x8x32xf32>
    %4 = vector.shape_cast %3 : vector<2x8x32xf32> to vector<16x32xf32>
    %cst = arith.constant 0.000000e+00 : f32
    %5 = vector.broadcast %cst : f32 to vector<2x1x32xf32>
    %6 = tpu.concatenate %5, %3, %5 in 1 : vector<2x1x32xf32>, vector<2x8x32xf32>, vector<2x1x32xf32> -> vector<2x10x32xf32>
    %7 = vector.extract_strided_slice %6 {offsets = [0, 0, 0], sizes = [2, 8, 32], strides = [1, 1, 1]} : vector<2x10x32xf32> to vector<2x8x32xf32>
    %8 = vector.extract_strided_slice %6 {offsets = [0, 1, 0], sizes = [2, 8, 32], strides = [1, 1, 1]} : vector<2x10x32xf32> to vector<2x8x32xf32>
    %9 = vector.extract_strided_slice %6 {offsets = [0, 2, 0], sizes = [2, 8, 32], strides = [1, 1, 1]} : vector<2x10x32xf32> to vector<2x8x32xf32>
    %10 = tpu.concatenate %7, %8, %9 in 2 : vector<2x8x32xf32>, vector<2x8x32xf32>, vector<2x8x32xf32> -> vector<2x8x96xf32>
    %11 = vector.shape_cast %10 : vector<2x8x96xf32> to vector<16x96xf32>
    %c0_3 = arith.constant 0 : index
    %c0_4 = arith.constant 0 : index
    %c0_5 = arith.constant 0 : index
    %12 = vector.load %arg3[%c0_3, %c0_4, %c0_5] : memref<1x96x64xf32, #tpu.memory_space<vmem>>, vector<1x96x64xf32>
    %13 = vector.shape_cast %12 : vector<1x96x64xf32> to vector<96x64xf32>
    %cst_6 = arith.constant dense<0.000000e+00> : vector<16x64xf32>
    %14 = tpu.matmul %11, %13, %cst_6 {dimension_numbers = #tpu.dot_dimension_numbers<[1], [0], [0], [1], [0, 0, 1, 1], [], []>} : vector<16x96xf32>, vector<96x64xf32>, vector<16x64xf32> -> vector<16x64xf32>
    %15 = vector.extract_strided_slice %14 {offsets = [0, 0], sizes = [16, 32], strides = [1, 1]} : vector<16x64xf32> to vector<16x32xf32>
    %16 = vector.extract_strided_slice %14 {offsets = [0, 32], sizes = [16, 32], strides = [1, 1]} : vector<16x64xf32> to vector<16x32xf32>
    %17 = arith.negf %16 : vector<16x32xf32>
    %18 = math.exp %17 : vector<16x32xf32>
    %cst_7 = arith.constant 1.000000e+00 : f32
    %19 = vector.broadcast %cst_7 : f32 to vector<16x32xf32>
    %20 = arith.addf %19, %18 : vector<16x32xf32>
    %21 = arith.divf %19, %20 : vector<16x32xf32>
    %22 = arith.mulf %15, %21 : vector<16x32xf32>
    %c0_8 = arith.constant 0 : index
    %c0_9 = arith.constant 0 : index
    %c0_10 = arith.constant 0 : index
    %23 = vector.load %arg6[%c0_8, %c0_9, %c0_10] : memref<1x8x32xf32, #tpu.memory_space<vmem>>, vector<1x8x32xf32>
    %24 = vector.shape_cast %23 : vector<1x8x32xf32> to vector<8x32xf32>
    %25 = vector.extract_strided_slice %24 {offsets = [0, 0], sizes = [1, 32], strides = [1, 1]} : vector<8x32xf32> to vector<1x32xf32>
    %26 = vector.extract_strided_slice %24 {offsets = [1, 0], sizes = [1, 32], strides = [1, 1]} : vector<8x32xf32> to vector<1x32xf32>
    %27 = vector.extract_strided_slice %24 {offsets = [2, 0], sizes = [1, 32], strides = [1, 1]} : vector<8x32xf32> to vector<1x32xf32>
    %28 = vector.extract_strided_slice %24 {offsets = [3, 0], sizes = [1, 32], strides = [1, 1]} : vector<8x32xf32> to vector<1x32xf32>
    %29 = vector.extract_strided_slice %24 {offsets = [4, 0], sizes = [1, 32], strides = [1, 1]} : vector<8x32xf32> to vector<1x32xf32>
    %30 = vector.extract_strided_slice %24 {offsets = [5, 0], sizes = [1, 32], strides = [1, 1]} : vector<8x32xf32> to vector<1x32xf32>
    %31 = arith.addf %4, %22 : vector<16x32xf32>
    %cst_11 = arith.constant dense<0.000000e+00> : vector<16xf32>
    %32 = vector.multi_reduction <add>, %31, %cst_11 [1] : vector<16x32xf32> to vector<16xf32>
    %33 = vector.shape_cast %32 : vector<16xf32> to vector<16x1xf32>
    %cst_12 = arith.constant 3.200000e+01 : f32
    %34 = vector.broadcast %cst_12 : f32 to vector<16x1xf32>
    %35 = arith.divf %33, %34 : vector<16x1xf32>
    %36 = vector.broadcast %35 : vector<16x1xf32> to vector<16x32xf32>
    %37 = arith.subf %31, %36 : vector<16x32xf32>
    %38 = arith.mulf %37, %37 : vector<16x32xf32>
    %cst_13 = arith.constant dense<0.000000e+00> : vector<16xf32>
    %39 = vector.multi_reduction <add>, %38, %cst_13 [1] : vector<16x32xf32> to vector<16xf32>
    %40 = vector.shape_cast %39 : vector<16xf32> to vector<16x1xf32>
    %cst_14 = arith.constant 3.200000e+01 : f32
    %41 = vector.broadcast %cst_14 : f32 to vector<16x1xf32>
    %42 = arith.divf %40, %41 : vector<16x1xf32>
    %43 = vector.broadcast %35 : vector<16x1xf32> to vector<16x32xf32>
    %44 = arith.subf %31, %43 : vector<16x32xf32>
    %cst_15 = arith.constant 9.99999974E-6 : f32
    %45 = vector.broadcast %cst_15 : f32 to vector<16x1xf32>
    %46 = arith.addf %42, %45 : vector<16x1xf32>
    %47 = math.rsqrt %46 : vector<16x1xf32>
    %48 = vector.broadcast %47 : vector<16x1xf32> to vector<16x32xf32>
    %49 = arith.mulf %44, %48 : vector<16x32xf32>
    %50 = vector.broadcast %27 : vector<1x32xf32> to vector<16x32xf32>
    %51 = arith.mulf %49, %50 : vector<16x32xf32>
    %52 = vector.broadcast %28 : vector<1x32xf32> to vector<16x32xf32>
    %53 = arith.addf %51, %52 : vector<16x32xf32>
    %c0_16 = arith.constant 0 : index
    %c0_17 = arith.constant 0 : index
    %c0_18 = arith.constant 0 : index
    %54 = vector.load %arg4[%c0_16, %c0_17, %c0_18] : memref<1x32x32xf32, #tpu.memory_space<vmem>>, vector<1x32x32xf32>
    %55 = vector.shape_cast %54 : vector<1x32x32xf32> to vector<32x32xf32>
    %cst_19 = arith.constant dense<0.000000e+00> : vector<16x32xf32>
    %56 = tpu.matmul %53, %55, %cst_19 {dimension_numbers = #tpu.dot_dimension_numbers<[1], [0], [0], [1], [0, 0, 1, 1], [], []>} : vector<16x32xf32>, vector<32x32xf32>, vector<16x32xf32> -> vector<16x32xf32>
    %57 = vector.broadcast %25 : vector<1x32xf32> to vector<16x32xf32>
    %58 = arith.addf %56, %57 : vector<16x32xf32>
    %cst_20 = arith.constant 0.000000e+00 : f32
    %59 = vector.broadcast %cst_20 : f32 to vector<16x32xf32>
    %60 = arith.maximumf %58, %59 : vector<16x32xf32>
    %c0_21 = arith.constant 0 : index
    %c0_22 = arith.constant 0 : index
    %c0_23 = arith.constant 0 : index
    %61 = vector.load %arg5[%c0_21, %c0_22, %c0_23] : memref<1x32x32xf32, #tpu.memory_space<vmem>>, vector<1x32x32xf32>
    %62 = vector.shape_cast %61 : vector<1x32x32xf32> to vector<32x32xf32>
    %cst_24 = arith.constant dense<0.000000e+00> : vector<16x32xf32>
    %63 = tpu.matmul %60, %62, %cst_24 {dimension_numbers = #tpu.dot_dimension_numbers<[1], [0], [0], [1], [0, 0, 1, 1], [], []>} : vector<16x32xf32>, vector<32x32xf32>, vector<16x32xf32> -> vector<16x32xf32>
    %64 = vector.broadcast %26 : vector<1x32xf32> to vector<16x32xf32>
    %65 = arith.addf %63, %64 : vector<16x32xf32>
    %66 = arith.addf %53, %65 : vector<16x32xf32>
    %cst_25 = arith.constant dense<0.000000e+00> : vector<16xf32>
    %67 = vector.multi_reduction <add>, %66, %cst_25 [1] : vector<16x32xf32> to vector<16xf32>
    %68 = vector.shape_cast %67 : vector<16xf32> to vector<16x1xf32>
    %cst_26 = arith.constant 3.200000e+01 : f32
    %69 = vector.broadcast %cst_26 : f32 to vector<16x1xf32>
    %70 = arith.divf %68, %69 : vector<16x1xf32>
    %71 = vector.broadcast %70 : vector<16x1xf32> to vector<16x32xf32>
    %72 = arith.subf %66, %71 : vector<16x32xf32>
    %73 = arith.mulf %72, %72 : vector<16x32xf32>
    %cst_27 = arith.constant dense<0.000000e+00> : vector<16xf32>
    %74 = vector.multi_reduction <add>, %73, %cst_27 [1] : vector<16x32xf32> to vector<16xf32>
    %75 = vector.shape_cast %74 : vector<16xf32> to vector<16x1xf32>
    %cst_28 = arith.constant 3.200000e+01 : f32
    %76 = vector.broadcast %cst_28 : f32 to vector<16x1xf32>
    %77 = arith.divf %75, %76 : vector<16x1xf32>
    %78 = vector.broadcast %70 : vector<16x1xf32> to vector<16x32xf32>
    %79 = arith.subf %66, %78 : vector<16x32xf32>
    %cst_29 = arith.constant 9.99999974E-6 : f32
    %80 = vector.broadcast %cst_29 : f32 to vector<16x1xf32>
    %81 = arith.addf %77, %80 : vector<16x1xf32>
    %82 = math.rsqrt %81 : vector<16x1xf32>
    %83 = vector.broadcast %82 : vector<16x1xf32> to vector<16x32xf32>
    %84 = arith.mulf %79, %83 : vector<16x32xf32>
    %85 = vector.broadcast %29 : vector<1x32xf32> to vector<16x32xf32>
    %86 = arith.mulf %84, %85 : vector<16x32xf32>
    %87 = vector.broadcast %30 : vector<1x32xf32> to vector<16x32xf32>
    %88 = arith.addf %86, %87 : vector<16x32xf32>
    %89 = vector.shape_cast %88 : vector<16x32xf32> to vector<2x8x32xf32>
    %c0_30 = arith.constant 0 : index
    %c0_31 = arith.constant 0 : index
    %c0_32 = arith.constant 0 : index
    %90 = vector.load %arg8[%c0_30, %c0_31, %c0_32] : memref<2x8x32xf32, #tpu.memory_space<vmem>>, vector<2x8x32xf32>
    tpu.vector_store %arg8[%c0_30, %c0_31, %c0_32], %89 {strides = array<i32>} : memref<2x8x32xf32, #tpu.memory_space<vmem>>, vector<2x8x32xf32>,
    %c2_i32 = arith.constant 2 : i32
    %91 = arith.cmpi eq, %arg1, %c2_i32 : i32
    %92 = arith.extui %91 : i1 to i32
    %c0_i32_33 = arith.constant 0 : i32
    %93 = arith.cmpi ne, %92, %c0_i32_33 : i32
    scf.if %93 {
      %c0_34 = arith.constant 0 : index
      %c0_35 = arith.constant 0 : index
      %c0_36 = arith.constant 0 : index
      %94 = vector.load %arg8[%c0_34, %c0_35, %c0_36] : memref<2x8x32xf32, #tpu.memory_space<vmem>>, vector<2x8x32xf32>
      %c0_37 = arith.constant 0 : index
      %c0_38 = arith.constant 0 : index
      %c0_39 = arith.constant 0 : index
      %95 = vector.load %arg7[%c0_37, %c0_38, %c0_39] : memref<2x8x32xf32, #tpu.memory_space<vmem>>, vector<2x8x32xf32>
      tpu.vector_store %arg7[%c0_37, %c0_38, %c0_39], %94 {strides = array<i32>} : memref<2x8x32xf32, #tpu.memory_space<vmem>>, vector<2x8x32xf32>,
    } else {
    }
    return
  }
  func.func @transform_0(%arg0: i32, %arg1: i32) -> (i32, i32, i32) {
    %c0_i32 = arith.constant 0 : i32
    %c0_i32_0 = arith.constant 0 : i32
    %c0_i32_1 = arith.constant 0 : i32
    return %arg0, %c0_i32, %c0_i32_0 : i32, i32, i32
  }
  func.func @transform_1(%arg0: i32, %arg1: i32) -> (i32, i32, i32) {
    %c0_i32 = arith.constant 0 : i32
    %c0_i32_0 = arith.constant 0 : i32
    %c0_i32_1 = arith.constant 0 : i32
    return %arg1, %c0_i32, %c0_i32_0 : i32, i32, i32
  }
  func.func @transform_2(%arg0: i32, %arg1: i32) -> (i32, i32, i32) {
    %c0_i32 = arith.constant 0 : i32
    %c0_i32_0 = arith.constant 0 : i32
    %c0_i32_1 = arith.constant 0 : i32
    return %arg1, %c0_i32, %c0_i32_0 : i32, i32, i32
  }
  func.func @transform_3(%arg0: i32, %arg1: i32) -> (i32, i32, i32) {
    %c0_i32 = arith.constant 0 : i32
    %c0_i32_0 = arith.constant 0 : i32
    %c0_i32_1 = arith.constant 0 : i32
    return %arg1, %c0_i32, %c0_i32_0 : i32, i32, i32
  }
  func.func @transform_4(%arg0: i32, %arg1: i32) -> (i32, i32, i32) {
    %c0_i32 = arith.constant 0 : i32
    %c0_i32_0 = arith.constant 0 : i32
    %c0_i32_1 = arith.constant 0 : i32
    return %arg1, %c0_i32, %c0_i32_0 : i32, i32, i32
  }
  func.func @transform_5(%arg0: i32, %arg1: i32) -> (i32, i32, i32) {
    %c0_i32 = arith.constant 0 : i32
    %c0_i32_0 = arith.constant 0 : i32
    %c0_i32_1 = arith.constant 0 : i32
    return %arg0, %c0_i32, %c0_i32_0 : i32, i32, i32
  }
}

</mosaic_0001>

<bundles_post_ra>
// kernel: tpu_custom_call.1
= control target key start
LH: loop header
LB: loop body
LE: loop exit
PB: predicated region body
PF: predicated region fallthrough
CT: control target
= control target key end

     0   :  { %10 = vsyncpa [#allocation4], 0  ;;  %s951_s18 = smov 0   ;;  %s953_s19 = smov 0   ;;  %s1083_s0 = inlined_call_operand.vmem [shape: f32[2,8,32], index: 0, kind: input, shape index: {}]   ;;  %s1084_s1 = inlined_call_operand.vmem [shape: f32[3,96,64], index: 1, kind: input, shape index: {}]   ;;  %s1085_s2 = inlined_call_operand.vmem [shape: f32[3,32,32], index: 2, kind: input, shape index: {}]   ;;  %s1086_s3 = inlined_call_operand.vmem [shape: f32[3,32,32], index: 3, kind: input, shape index: {}]   ;;  %s1087_s4 = inlined_call_operand.vmem [shape: f32[3,8,32], index: 4, kind: input, shape index: {}]   ;;  %s1088_s5 = inlined_call_operand.hbm [shape: f32[2,8,32], index: 5, kind: output, shape index: {}]  }
   0x1   :  { %s955_s20 = smov 0  }
   0x2 LB: > { %s763_s21 = sadd.s32 4294967295, %s912_s20   ;;  %s25_s22 = sadd.s32 1, %s908_s19  ;;  %s912_s20 = sphi %s955_s20, %s16_s20   ;;  %s908_s19 = sphi %s953_s19, %s1090_s19   ;;  %s904_s18 = sphi %s951_s18, %s1089_s18  }
   0x3   : > { %p26_p0 = scmp.ge.s32.totalorder %s25_s22, 3  ;;  %p767_p1 = scmp.ge.s32.totalorder %s912_s20, 1 }
   0x4   : > { %p240_p2 = scmp.lt.s32.totalorder %s912_s20, 4 }
   0x5   : > { %s1092_s22 = smov (%p26_p0, %s25_s22), 0 }
   0x6   : > { %p241_p3 = pnand %p767_p1, %p240_p2 }
   0x7   : > { %p288_p4 = scmp.lt.s32.totalorder (!%p241_p3), %s904_s18, 2  ;;  %p774_p5 = scmp.ne.s32.totalorder (!%p241_p3), %s904_s18, 0 }
   0x8   : > { %244 = sbr.rel (%p241_p3) target bundleno = 1232 (0x4d0), region = 40 }
   0xd   : > { %s289_s23 = scalar_select %p288_p4, %s904_s18, 2 }
   0xe   : > { %311 = sbr.rel (%p774_p5) target bundleno = 22 (0x16), region = 44 }
   0xf   : > { %s802_s24 = smul.u32 96, %s289_s23  ;;  %s788_s25 = sshll.u32 %s289_s23, 5 }
  0x10   : > { %s977_s28 = scalar_lea.vmem %s1085_s2, %s788_s25  ;;  %s982_s6 = scalar_lea.vmem %s1086_s3, %s788_s25 }
  0x11   : > { %s987_s9 = scalar_lea.vmem %s1084_s1, %s802_s24  ;;  %s773_s10 = sshll.u32 %s289_s23, 3 }
  0x12   : > { %s992_s13 = scalar_lea.vmem %s1087_s4, %s773_s10 }
  0x13   : > { %v312_v0 = vld [vmem:[%s1083_s0] sm:$0xff]  ;;  %vm314_vm0 = vcmask 261120   ;;  %v313_v1 = vld [vmem:[%s1083_s0 + $0x8] sm:$0xff] }
  0x14   : > { %315 = vst.msk [vmem:[#allocation2] sm:$0xff] %vm314_vm0, %v312_v0 }
  0x15   : > { %316 = vst.msk [vmem:[#allocation2 + $0x8] sm:$0xff] %vm314_vm0, %v313_v1 }
  0x16 PF: > { %vm325_vm1 = vcmask 1040384   ;;  %v377_v6 = vld [vmem:[%s987_s9 + $0x58] sm:$0xff]  ;;  %v376_v7 = vld [vmem:[%s987_s9 + $0x50] sm:$0xff]  ;;  %vm334_vm2 = vcmask 1046528   ;;  %v375_v12 = vld [vmem:[%s987_s9 + $0x48] sm:$0xff]  ;;  %s914_s23 = smov 32  }
  0x17   : > { %389 = vmatpush.msra.mxu0 %v377_v6  ;;  %790 = vmatpush.msra.mxu3 %v377_v6  ;;  %v374_v17 = vld [vmem:[%s987_s9 + $0x40] sm:$0xff]  ;;  %v373_v20 = vld [vmem:[%s987_s9 + $0x38] sm:$0xff]  ;;  %vm347_vm3 = vcmask 1045504   ;;  %v372_v25 = vld [vmem:[%s987_s9 + $0x30] sm:$0xff]  ;;  %s915_s24 = smov 64   ;;  %vm360_vm4 = vcmask 261120  }
  0x18   : > { %v371_v26 = vld [vmem:[%s987_s9 + $0x28] sm:$0xff]  ;;  %v370_v29 = vld [vmem:[%s987_s9 + $0x20] sm:$0xff]  ;;  %v369_v30 = vld [vmem:[%s987_s9 + $0x18] sm:$0xff]  ;;  %vm363_vm5 = vcmask 523264   ;;  %vm378_vm6 = vcmask 785408   ;;  %s916_s25 = smov 96  }
  0x19   : > { %390 = vmatpush.msra.mxu0 %v376_v7  ;;  %791 = vmatpush.msra.mxu3 %v376_v7  ;;  %v368_v31 = vld [vmem:[%s987_s9 + $0x10] sm:$0xff]  ;;  %v367_v32 = vld [vmem:[%s987_s9 + $0x8] sm:$0xff]  ;;  %v366_v33 = vld [vmem:[%s987_s9] sm:$0xff]  ;;  %p783_p6 = scmp.ne.s32.totalorder %s904_s18, 2 }
  0x1b   : > { %v1003_v3 = vld [vmem:[#allocation2] sm:$0xff]  ;;  %391 = vmatpush.msra.mxu0 %v375_v12  ;;  %792 = vmatpush.msra.mxu3 %v375_v12 }
  0x1c   : > { %v1001_v2 = vld [vmem:[#allocation2 + $0x8] sm:$0xff]  ;;  %v321_v5 = vrot.slane %v1003_v3, 7 }
  0x1d   : > { %v322_v4 = vrot.slane %v1001_v2, 7  ;;  %392 = vmatpush.msra.mxu0 %v374_v17  ;;  %793 = vmatpush.msra.mxu3 %v374_v17 }
  0x1e   : > { %v326_v10 = vsel %vm325_vm1, 0.0, %v321_v5  ;;  %v328_v11 = vsel %vm325_vm1, %v321_v5, 0.0 }
  0x1f   : > { %v327_v8 = vsel %vm325_vm1, 0.0, %v322_v4  ;;  %v329_v9 = vsel %vm325_vm1, %v322_v4, 0.0  ;;  %v335_v15 = vrot.slane %v326_v10, 1  ;;  %v336_v16 = vrot.slane %v328_v11, 1  ;;  %393 = vmatpush.msra.mxu0 %v373_v20  ;;  %794 = vmatpush.msra.mxu3 %v373_v20 }
  0x20   : > { %v338_v13 = vrot.slane %v327_v8, 1  ;;  %v339_v14 = vrot.slane %v329_v9, 1  ;;  %v351_v21 = vrot.slane %v327_v8, 2  ;;  %v352_v22 = vrot.slane %v329_v9, 2 }
  0x21   : > { %v337_v19 = vsel %vm334_vm2, %v335_v15, %v336_v16  ;;  %v348_v23 = vrot.slane %v326_v10, 2  ;;  %v349_v24 = vrot.slane %v328_v11, 2  ;;  %394 = vmatpush.msra.mxu0 %v372_v25  ;;  %795 = vmatpush.msra.mxu3 %v372_v25  ;;  %v917_v16 = vmov 32.0  }
  0x22   : > { %v340_v18 = vsel %vm334_vm2, %v338_v13, %v339_v14  ;;  %341 = vrot.lane.b32.xlu0 %v337_v19, %s914_s23  ;;  %v353_v27 = vsel %vm347_vm3, %v351_v21, %v352_v22 }
  0x23   : > { %343 = vrot.lane.b32.xlu1 %v340_v18, %s914_s23  ;;  %v350_v28 = vsel %vm347_vm3, %v348_v23, %v349_v24  ;;  %395 = vmatpush.msra.mxu0 %v371_v26 }
  0x24   : > { %796 = vmatpush.msra.mxu3 %v371_v26 }
  0x25   : > { %396 = vmatpush.msra.mxu0 %v370_v29 }
  0x26   : > { %797 = vmatpush.msra.mxu3 %v370_v29 }
  0x27   : > { %397 = vmatpush.msra.mxu0 %v369_v30 }
  0x28   : > { %798 = vmatpush.msra.mxu3 %v369_v30 }
  0x29   : > { %398 = vmatpush.msra.mxu0 %v368_v31 }
  0x2a   : > { %354 = vrot.lane.b32.xlu0 %v350_v28, %s915_s24  ;;  %799 = vmatpush.msra.mxu3 %v368_v31  ;;  %v519_v31 = vld [vmem:[%s977_s28 + $0x18] sm:$0xff] }
  0x2b   : > { %356 = vrot.lane.b32.xlu1 %v353_v27, %s915_s24  ;;  %399 = vmatpush.msra.mxu0 %v367_v32 }
  0x2c   : > { %800 = vmatpush.msra.mxu3 %v367_v32  ;;  %539 = vmatpush.msra.mxu1 %v519_v31  ;;  %v518_v32 = vld [vmem:[%s977_s28 + $0x10] sm:$0xff] }
  0x2d   : > { %400 = vmatpush.msra.mxu0 %v366_v33 }
  0x2e   : > { %801 = vmatpush.msra.mxu3 %v366_v33  ;;  %540 = vmatpush.msra.mxu1 %v518_v32  ;;  %v517_v33 = vld [vmem:[%s977_s28 + $0x8] sm:$0xff] }
  0x30   : > { %541 = vmatpush.msra.mxu1 %v517_v33 }
  0x94   : > { %v342_v35 = vpop.permute.xlu0 %341 }
  0x95   : > { %v344_v34 = vpop.permute.xlu1 %343  ;;  %v361_v37 = vsel %vm360_vm4, %v326_v10, %v342_v35 }
  0x96   : > { %v362_v36 = vsel %vm360_vm4, %v327_v8, %v344_v34  ;;  %v516_v34 = vld [vmem:[%s977_s28] sm:$0xff] }
  0x97   : > { %542 = vmatpush.msra.mxu1 %v516_v34 }
  0x9c   : > { %v355_v39 = vpop.permute.xlu0 %354 }
  0x9d   : > { %v357_v38 = vpop.permute.xlu1 %356  ;;  %v364_v40 = vsel %vm363_vm5, %v361_v37, %v355_v39 }
  0x9e   : > { %v365_v41 = vsel %vm363_vm5, %v362_v36, %v357_v38  ;;  %775 = vmatmul.msk.f32.vlgmr.msra.gmra.mxu0 %vm378_vm6, %v364_v40  ;;  %v555_v38 = vld [vmem:[%s982_s6 + $0x18] sm:$0xff] }
  0x9f   : > { %776 = vmatmul.msk.f32.vlgmr.msra.gmra.mxu3 %vm378_vm6, %v365_v41  ;;  %575 = vmatpush.msra.mxu2 %v555_v38 }
 0x11b   : > { %v402_v42 = vpop.f32.mrf.mxu0 }
 0x11c   : > { %v777_v43 = vmul.f32 -1.442695, %v402_v42 }
 0x11e   : > { %840 = vpow2.f32 %v777_v43 }
 0x122   : > { %v405_v44 = vpop.f32.mrf.mxu3 }
 0x123   : > { %v778_v45 = vmul.f32 -1.442695, %v405_v44 }
 0x124   : > { %v841_v46 = vpop.eup %840 }
 0x125   : > { %842 = vpow2.f32 %v778_v45  ;;  %v414_v47 = vadd.f32 1.0, %v841_v46 }
 0x127   : > { %844 = vrcp.f32 %v414_v47  ;;  %v427_v53 = vand.u32 2147483648, %v414_v47  ;;  %v425_v55 = vand.u32 2147483647, %v414_v47  ;;  %vm421_vm8 = vweird.f32 %v414_v47 }
 0x129   : > { %v428_v59 = vor.u32 1.1754944e-38, %v427_v53  ;;  %vm426_vm10 = vcmp.eq.f32.partialorder %v425_v55, 8.507059e+37 }
 0x12b   : > { %v843_v48 = vpop.eup %842 }
 0x12c   : > { %v415_v49 = vadd.f32 1.0, %v843_v48 }
 0x12d   : > { %v845_v50 = vpop.eup %844 }
 0x12e   : > { %846 = vrcp.f32 %v415_v49  ;;  %v417_v51 = vmul.f32 %v845_v50, %v414_v47  ;;  %vm422_vm7 = vweird.f32 %v845_v50  ;;  %v442_v0 = vand.u32 2147483648, %v415_v49  ;;  %v1041_v47 = vld [vmem:[%s992_s13] sm:$0xff] }
 0x12f   : > { %vm423_vm9 = vmor %vm421_vm8, %vm422_vm7  ;;  %vm436_vm12 = vweird.f32 %v415_v49  ;;  %v440_v4 = vand.u32 2147483647, %v415_v49  ;;  %848 = vrcp.f32 %v917_v16  ;;  %v513_v55 = vperm.slane %v1041_v47, 3 }
 0x130   : > { %v418_v52 = vsub.f32 1.0, %v417_v51  ;;  %v443_v6 = vor.u32 1.1754944e-38, %v442_v0  ;;  %v510_v51 = vperm.slane %v1041_v47, 2 }
 0x131   : > { %vm441_vm14 = vcmp.eq.f32.partialorder %v440_v4, 8.507059e+37  ;;  %v553_v4 = vld [vmem:[%s982_s6 + $0x8] sm:$0xff] }
 0x132   : > { %v419_v54 = vmul.f32 %v845_v50, %v418_v52 }
 0x134   : > { %v847_v56 = vpop.eup %846  ;;  %v420_v57 = vadd.f32 %v845_v50, %v419_v54 }
 0x135   : > { %v432_v58 = vmul.f32 %v847_v56, %v415_v49  ;;  %vm437_vm11 = vweird.f32 %v847_v56  ;;  %v849_v17 = vpop.eup %848 }
 0x136   : > { %v424_v60 = vsel %vm423_vm9, %v845_v50, %v420_v57  ;;  %vm438_vm13 = vmor %vm436_vm12, %vm437_vm11  ;;  %v466_v18 = vmul.f32 32.0, %v849_v17  ;;  %vm470_vm15 = vweird.f32 %v849_v17 }
 0x137   : > { %v433_v61 = vsub.f32 1.0, %v432_v58  ;;  %v429_v62 = vsel %vm426_vm10, %v428_v59, %v424_v60 }
 0x138   : > { %448 = vrot.lane.b32.xlu2 %v429_v62, %s916_s25  ;;  %v467_v19 = vsub.f32 1.0, %v466_v18 }
 0x139   : > { %v434_v63 = vmul.f32 %v847_v56, %v433_v61 }
 0x13a   : > { %v468_v20 = vmul.f32 %v849_v17, %v467_v19 }
 0x13b   : > { %v435_v1 = vadd.f32 %v847_v56, %v434_v63 }
 0x13c   : > { %v469_v21 = vadd.f32 %v849_v17, %v468_v20 }
 0x13d   : > { %v439_v5 = vsel %vm438_vm13, %v847_v56, %v435_v1  ;;  %v554_v1 = vld [vmem:[%s982_s6 + $0x10] sm:$0xff] }
 0x13e   : > { %v444_v7 = vsel %vm441_vm14, %v443_v6, %v439_v5  ;;  %576 = vmatpush.msra.mxu2 %v554_v1  ;;  %v552_v5 = vld [vmem:[%s982_s6] sm:$0xff]  ;;  %v520_v6 = vperm.slane %v1041_v47, 0 }
 0x140   : > { %450 = vrot.lane.b32.xlu2 %v444_v7, %s916_s25  ;;  %577 = vmatpush.msra.mxu2 %v553_v4 }
 0x142   : > { %578 = vmatpush.msra.mxu2 %v552_v5 }
 0x192   : > { %v449_v8 = vpop.permute.xlu2 %448 }
 0x193   : > { %v454_v9 = vmul.f32 %v449_v8, %v402_v42 }
 0x195   : > { %v457_v10 = vadd.f32 %v454_v9, %v1003_v3  ;;  %v1027_v3 = vsel %vm470_vm15, %v849_v17, %v469_v21 }
 0x197   : > { %v459_v11 = vsel %vm360_vm4, %v457_v10, 0.0 }
 0x198   : > { %460 = vadd.xlane.f32.xlu0 %v459_v11 }
 0x19a   : > { %v451_v12 = vpop.permute.xlu2 %450 }
 0x19b   : > { %v455_v13 = vmul.f32 %v451_v12, %v405_v44 }
 0x19d   : > { %v458_v14 = vadd.f32 %v455_v13, %v1001_v2  ;;  %v556_v13 = vperm.slane %v1041_v47, 1 }
 0x19f   : > { %v462_v15 = vsel %vm360_vm4, %v458_v14, 0.0 }
 0x1a0   : > { %463 = vadd.xlane.f32.xlu1 %v462_v15 }
 0x20b   : > { %v461_v22 = vpop.xlane.xlu0 %460 }
 0x20c   : > { %v472_v23 = vmul.f32 %v1027_v3, %v461_v22 }
 0x20e   : > { %v474_v2 = vsub.f32 %v457_v10, %v472_v23 }
 0x210   : > { %v476_v24 = vmul.f32 %v474_v2, %v474_v2 }
 0x212   : > { %v478_v25 = vsel %vm360_vm4, %v476_v24, 0.0 }
 0x213   : > { %479 = vadd.xlane.f32.xlu2 %v478_v25  ;;  %v464_v26 = vpop.xlane.xlu1 %463 }
 0x214   : > { %v473_v27 = vmul.f32 %v1027_v3, %v464_v26 }
 0x216   : > { %v475_v28 = vsub.f32 %v458_v14, %v473_v27 }
 0x218   : > { %v477_v29 = vmul.f32 %v475_v28, %v475_v28 }
 0x21a   : > { %v481_v30 = vsel %vm360_vm4, %v477_v29, 0.0 }
 0x21b   : > { %482 = vadd.xlane.f32.xlu2 %v481_v30 }
 0x286   : > { %v480_v35 = vpop.xlane.xlu2 %479 }
 0x287   : > { %v484_v36 = vmul.f32 %v480_v35, %v1027_v3 }
 0x289   : > { %v486_v37 = vadd.f32 1e-05, %v484_v36 }
 0x28b   : > { %850 = vrsqrt.f32 %v486_v37  ;;  %vm494_vm1 = vweird.f32 %v486_v37 }
 0x28e   : > { %v483_v39 = vpop.xlane.xlu2 %482 }
 0x28f   : > { %v485_v40 = vmul.f32 %v483_v39, %v1027_v3 }
 0x291   : > { %v851_v41 = vpop.eup %850  ;;  %v487_v42 = vadd.f32 1e-05, %v485_v40 }
 0x292   : > { %v489_v43 = vmul.f32 %v851_v41, %v486_v37  ;;  %vm495_vm0 = vweird.f32 %v851_v41 }
 0x293   : > { %852 = vrsqrt.f32 %v487_v42  ;;  %vm496_vm2 = vmor %vm494_vm1, %vm495_vm0  ;;  %vm504_vm5 = vweird.f32 %v487_v42 }
 0x294   : > { %v490_v44 = vmul.f32 %v851_v41, %v489_v43 }
 0x296   : > { %v491_v45 = vmul.f32 0.5, %v490_v44 }
 0x298   : > { %v492_v46 = vsub.f32 1.5, %v491_v45  ;;  %v632_v45 = vperm.slane %v1041_v47, 4 }
 0x299   : > { %v853_v48 = vpop.eup %852 }
 0x29a   : > { %v493_v49 = vmul.f32 %v851_v41, %v492_v46  ;;  %v499_v50 = vmul.f32 %v853_v48, %v487_v42  ;;  %vm505_vm3 = vweird.f32 %v853_v48 }
 0x29b   : > { %vm506_vm6 = vmor %vm504_vm5, %vm505_vm3 }
 0x29c   : > { %v497_v52 = vsel %vm496_vm2, %v851_v41, %v493_v49  ;;  %v500_v53 = vmul.f32 %v853_v48, %v499_v50  ;;  %v635_v49 = vperm.slane %v1041_v47, 5 }
 0x29d   : > { %v508_v54 = vmul.f32 %v497_v52, %v474_v2 }
 0x29e   : > { %v501_v56 = vmul.f32 0.5, %v500_v53 }
 0x29f   : > { %v511_v57 = vmul.f32 %v510_v51, %v508_v54 }
 0x2a0   : > { %v502_v58 = vsub.f32 1.5, %v501_v56 }
 0x2a1   : > { %v514_v59 = vadd.f32 %v513_v55, %v511_v57 }
 0x2a2   : > { %v503_v60 = vmul.f32 %v853_v48, %v502_v58 }
 0x2a3   : > { %779 = vmatmul.msk.f32.vlgmr.msra.gmra.mxu1 %vm360_vm4, %v514_v59 }
 0x2a4   : > { %v507_v61 = vsel %vm506_vm6, %v853_v48, %v503_v60 }
 0x2a5   : > { %v509_v62 = vmul.f32 %v507_v61, %v475_v28 }
 0x2a7   : > { %v512_v63 = vmul.f32 %v510_v51, %v509_v62 }
 0x2a9   : > { %v515_v0 = vadd.f32 %v513_v55, %v512_v63 }
 0x2ab   : > { %780 = vmatmul.msk.f32.gmra.mxu1 %vm360_vm4, %v515_v0 }
 0x320   : > { %v544_v7 = vpop.f32.mrf.mxu1 }
 0x321   : > { %v545_v8 = vadd.f32 %v544_v7, %v520_v6 }
 0x323   : > { %v550_v9 = vmax.f32 %v545_v8, 0.0 }
 0x325   : > { %781 = vmatmul.msk.f32.vlgmr.msra.gmra.mxu2 %vm360_vm4, %v550_v9 }
 0x328   : > { %v547_v10 = vpop.f32.mrf.mxu1 }
 0x329   : > { %v548_v11 = vadd.f32 %v547_v10, %v520_v6 }
 0x32b   : > { %v551_v12 = vmax.f32 %v548_v11, 0.0 }
 0x32d   : > { %782 = vmatmul.msk.f32.gmra.mxu2 %vm360_vm4, %v551_v12 }
 0x3a8   : > { %v580_v14 = vpop.f32.mrf.mxu2 }
 0x3a9   : > { %v581_v15 = vadd.f32 %v580_v14, %v556_v13 }
 0x3ab   : > { %v586_v16 = vadd.f32 %v581_v15, %v514_v59 }
 0x3ad   : > { %v588_v17 = vsel %vm360_vm4, %v586_v16, 0.0 }
 0x3ae   : > { %589 = vadd.xlane.f32.xlu0 %v588_v17 }
 0x3b0   : > { %v583_v18 = vpop.f32.mrf.mxu2 }
 0x3b1   : > { %v584_v19 = vadd.f32 %v583_v18, %v556_v13 }
 0x3b3   : > { %v587_v20 = vadd.f32 %v584_v19, %v515_v0 }
 0x3b5   : > { %v591_v21 = vsel %vm360_vm4, %v587_v20, 0.0 }
 0x3b6   : > { %592 = vadd.xlane.f32.xlu1 %v591_v21 }
 0x421   : > { %v590_v22 = vpop.xlane.xlu0 %589 }
 0x422   : > { %v594_v23 = vmul.f32 %v590_v22, %v1027_v3 }
 0x424   : > { %v596_v2 = vsub.f32 %v586_v16, %v594_v23 }
 0x426   : > { %v598_v24 = vmul.f32 %v596_v2, %v596_v2 }
 0x428   : > { %v600_v25 = vsel %vm360_vm4, %v598_v24, 0.0 }
 0x429   : > { %601 = vadd.xlane.f32.xlu2 %v600_v25  ;;  %v593_v26 = vpop.xlane.xlu1 %592 }
 0x42a   : > { %v595_v27 = vmul.f32 %v593_v26, %v1027_v3 }
 0x42c   : > { %v597_v28 = vsub.f32 %v587_v20, %v595_v27 }
 0x42e   : > { %v599_v29 = vmul.f32 %v597_v28, %v597_v28 }
 0x430   : > { %v603_v30 = vsel %vm360_vm4, %v599_v29, 0.0 }
 0x431   : > { %604 = vadd.xlane.f32.xlu0 %v603_v30 }
 0x49c   : > { %v602_v31 = vpop.xlane.xlu2 %601 }
 0x49d   : > { %v606_v32 = vmul.f32 %v602_v31, %v1027_v3 }
 0x49f   : > { %v608_v33 = vadd.f32 1e-05, %v606_v32 }
 0x4a1   : > { %854 = vrsqrt.f32 %v608_v33  ;;  %vm616_vm8 = vweird.f32 %v608_v33 }
 0x4a4   : > { %v605_v34 = vpop.xlane.xlu0 %604 }
 0x4a5   : > { %v607_v35 = vmul.f32 %v605_v34, %v1027_v3 }
 0x4a7   : > { %v855_v36 = vpop.eup %854  ;;  %v609_v37 = vadd.f32 1e-05, %v607_v35 }
 0x4a8   : > { %v611_v38 = vmul.f32 %v855_v36, %v608_v33  ;;  %vm617_vm7 = vweird.f32 %v855_v36 }
 0x4a9   : > { %856 = vrsqrt.f32 %v609_v37  ;;  %vm618_vm9 = vmor %vm616_vm8, %vm617_vm7  ;;  %vm626_vm11 = vweird.f32 %v609_v37 }
 0x4aa   : > { %v612_v39 = vmul.f32 %v855_v36, %v611_v38 }
 0x4ac   : > { %v613_v40 = vmul.f32 0.5, %v612_v39 }
 0x4ae   : > { %v614_v41 = vsub.f32 1.5, %v613_v40 }
 0x4af   : > { %v857_v42 = vpop.eup %856 }
 0x4b0   : > { %v615_v43 = vmul.f32 %v855_v36, %v614_v41  ;;  %v621_v44 = vmul.f32 %v857_v42, %v609_v37  ;;  %vm627_vm10 = vweird.f32 %v857_v42 }
 0x4b1   : > { %vm628_vm12 = vmor %vm626_vm11, %vm627_vm10 }
 0x4b2   : > { %v619_v46 = vsel %vm618_vm9, %v855_v36, %v615_v43  ;;  %v622_v48 = vmul.f32 %v857_v42, %v621_v44 }
 0x4b3   : > { %v630_v3 = vmul.f32 %v619_v46, %v596_v2 }
 0x4b4   : > { %v623_v50 = vmul.f32 0.5, %v622_v48 }
 0x4b5   : > { %v633_v51 = vmul.f32 %v632_v45, %v630_v3 }
 0x4b6   : > { %v624_v52 = vsub.f32 1.5, %v623_v50 }
 0x4b7   : > { %v636_v53 = vadd.f32 %v635_v49, %v633_v51 }
 0x4b8   : > { %v625_v54 = vmul.f32 %v857_v42, %v624_v52 }
 0x4b9   : > { %638 = vst.msk [vmem:[#allocation2] sm:$0xff] %vm360_vm4, %v636_v53 }
 0x4ba   : > { %v629_v55 = vsel %vm628_vm12, %v857_v42, %v625_v54 }
 0x4bb   : > { %v631_v56 = vmul.f32 %v629_v55, %v597_v28 }
 0x4bd   : > { %v634_v57 = vmul.f32 %v632_v45, %v631_v56  ;;  %643 = sbr.rel (%p783_p6) target bundleno = 1226 (0x4ca), region = 48 }
 0x4bf   : > { %v637_v58 = vadd.f32 %v635_v49, %v634_v57 }
 0x4c1   : > { %639 = vst.msk [vmem:[#allocation2 + $0x8] sm:$0xff] %vm360_vm4, %v637_v58 }
 0x4c2   : > { %v644_v47 = vld [vmem:[#allocation2] sm:$0xff] }
 0x4c3   : > { %646 = vst.msk [vmem:[#allocation3] sm:$0xff] %vm360_vm4, %v644_v47 }
 0x4c8   : > { %v645_v59 = vld [vmem:[#allocation2 + $0x8] sm:$0xff] }
 0x4c9   : > { %647 = vst.msk [vmem:[#allocation3 + $0x8] sm:$0xff] %vm360_vm4, %v645_v59 }
 0x4ca PF: > { %p807_p7 = scmp.eq.s32.totalorder %s763_s21, 2  ;;  %s658_s28 = sshll.u32 %s1088_s5, 4  ;;  %s659_s28 = int_to_ptr.hbm [resolvable:$true] %s658_s28 }
 0x4cb   : > { %s918_s29 = smov [#allocation3]   ;;  %s919_s18 = smov 128  }
 0x4cc   : > { %s656_s30 = sshll.u32 %s918_s29, 4  ;;  %s920_s6 = smov 8   ;;  %s657_s30 = int_to_ptr.vmem [resolvable:$true] %s656_s30 }
 0x4cd   : > { %804 = dma.vmem_to_hbm [thread:$0]  (%p807_p7), %s657_s30, 256, %s659_s28, [#allocation4], %s919_s18, %s919_s18, %s920_s6  }
 0x4ce   : > { %899 = dma.done.wait (%p807_p7), [#allocation4], 256  }
 0x4cf   : > { %901 = vsyncadd (%p807_p7), [#allocation4], 4294967040 }
 0x4d0 PF: > { %s16_s20 = sadd.s32 1, %s912_s20   ;;  %s1089_s18 = smov %s908_s19 }
 0x4d1   : > { %p13_p8 = scmp.ge.s32.totalorder %s16_s20, 5   ;;  %s1090_s19 = smov %s1092_s22 }
 0x4d3   :  { %15 = sbr.rel (!%p13_p8) target bundleno = 2 (0x2), region = 88 }
 0x4d8   :  { %675 = vsyncpa [#allocation4], 1 }
 0x4d9   :  { %677 = vsyncpa [#allocation4 + $0x1], 1 }

</bundles_post_ra>
